<compile_context>
chip_gen: v6e
topology: v6e:2x2x1
jax: 0.10.0
libtpu: 0.0.40
codegen_flags: <defaults>
</compile_context>

<pallas_src>
import jax
import jax.numpy as jnp
from jax.experimental import pallas as pl
from jax.experimental.pallas import tpu as pltpu

# ---------------------------------------------------------------------------
# model sizes
# ---------------------------------------------------------------------------
B, C, H, W = 2, 4, 16, 16          # demo input: (batch, channels, height, width)
D_IN = C * H * W                   # 1024 after Flatten
HID = 128                          # hidden width (lane-dense)
LN_EPS = 1e-5
TM_MAX = 512                       # big-batch tile: ~85% of HBM roofline

# contract the last dim of both operands: A @ B^T (the q @ k^T pattern)
_NT_DIMS = (((1,), (1,)), ((), ()))


# ---------------------------------------------------------------------------
# Pallas kernel: Linear -> ReLU -> LayerNorm -> Linear -> ReLU -> head
# ---------------------------------------------------------------------------
def _ffn_kernel(x_ref, w1_ref, w2_ref, p_ref, o_ref):
    # x: (TM, D_IN) f32 | w1: (D_IN, HID) bf16 | w2: (HID, HID) bf16
    # p: (8, HID) f32 packed small params      | o: (1, 1, TM) f32
    p = p_ref[...]
    b1    = p[0:1, :]
    gamma = p[1:2, :]
    beta  = p[2:3, :]
    b2    = p[3:4, :]
    w3row = p[4:5, :]                                     # (1, HID)
    b3    = p[5:6, 0:1]                                   # (1, 1) scalar

    # f32 -> bf16 cast in-kernel (one VPU pass, hidden under the x DMA); the
    # MXU runs bf16 and accumulates in f32.
    xb = x_ref[...].astype(jnp.bfloat16)

    # Linear 1 + ReLU
    h1 = jnp.dot(xb, w1_ref[...], preferred_element_type=jnp.float32)
    h1 = jnp.maximum(h1 + b1, 0.0)

    # LayerNorm over the feature axis (f32 math, biased variance, eps=1e-5)
    mean = jnp.mean(h1, axis=-1, keepdims=True)
    cen = h1 - mean
    var = jnp.mean(cen * cen, axis=-1, keepdims=True)
    h1n = cen * jax.lax.rsqrt(var + LN_EPS) * gamma + beta

    # Dropout(p=0.1) in eval mode is the identity -> nothing to do.
    # TODO(synk): train-mode dropout (in-kernel PRNG masking) is not implemented.

    # Linear 2 + ReLU
    h2 = jnp.dot(h1n.astype(jnp.bfloat16), w2_ref[...],
                 preferred_element_type=jnp.float32)
    h2 = jnp.maximum(h2 + b2, 0.0)

    # Output head (HID -> 1), produced directly in lane-dense (1, TM) form:
    # w3 (1,HID) contracted with h2 (TM,HID) on the HID axis (NT matmul on the
    # MXU, which has ample slack).  This replaces the old (TM,128) broadcast
    # slab: the store is a packed, full-lane row of 4 B per batch element.
    head = jax.lax.dot_general(w3row, h2, _NT_DIMS,
                               preferred_element_type=jnp.float32)   # (1, TM)
    o_ref[...] = (head + b3).reshape(o_ref.shape)


# ---------------------------------------------------------------------------
# wrapper
# ---------------------------------------------------------------------------
def _round_up(n, m):
    return ((n + m - 1) // m) * m


def _pick_tile(bsz):
    """Adaptive batch tile: big for large batches, exact for tiny ones."""
    if bsz <= 16:
        return bsz                     # single tile; block dims == array dims
    if bsz <= TM_MAX:
        # split into >=2 tiles so the "parallel" batch axis can shard across
        # the two TensorCores on v7x
        return max(8, _round_up(pl.cdiv(bsz, 2), 8))
    return TM_MAX


def earth_systems_nn_forward(x_nchw, params):
    """Run the fused feedforward network. x_nchw: (B, C, H, W) float32."""
    (w1, b1, gamma, beta, w2, b2, w3_row, b3) = params

    bsz = x_nchw.shape[0]
    # torch Flatten() == row-major reshape of NCHW.  x stays f32: the bf16
    # cast happens inside the kernel (avoids an extra full HBM pass), and
    # there is NO jnp.pad — the (possibly ragged) last batch tile is masked
    # by Pallas and its garbage rows are row-local and sliced off below.
    x2d = x_nchw.reshape(bsz, D_IN)

    tm = _pick_tile(bsz)
    n_tiles = pl.cdiv(bsz, tm)

    # bf16 weights (halves weight DMA; weights are VMEM-resident across tiles).
    w1b = w1.astype(jnp.bfloat16)
    w2b = w2.astype(jnp.bfloat16)

    # Pack the five small params into one (8, HID) f32 slab -> single DMA.
    packed = jnp.zeros((8, HID), jnp.float32)
    packed = (packed.at[0].set(b1)
                    .at[1].set(gamma)
                    .at[2].set(beta)
                    .at[3].set(b2)
                    .at[4].set(w3_row)
                    .at[5].set(jnp.full((HID,), b3, jnp.float32)))

    out = pl.pallas_call(
        _ffn_kernel,
        out_shape=jax.ShapeDtypeStruct((n_tiles, 1, tm), jnp.float32),
        grid=(n_tiles,),
        in_specs=[
            pl.BlockSpec((tm, D_IN), lambda i: (i, 0)),     # x: tiled over batch
            pl.BlockSpec((D_IN, HID), lambda i: (0, 0)),    # w1: VMEM-resident
            pl.BlockSpec((HID, HID), lambda i: (0, 0)),     # w2: VMEM-resident
            pl.BlockSpec((8, HID), lambda i: (0, 0)),       # packed small params
        ],
        out_specs=pl.BlockSpec((1, 1, tm), lambda i: (i, 0, 0)),
        compiler_params=pltpu.CompilerParams(
            dimension_semantics=("parallel",)),             # megacore on v7x
    )(x2d, w1b, w2b, packed)

    # Flatten tiles back to the batch axis, drop ragged-tile garbage rows.
    return out.reshape(-1)[:bsz].reshape(bsz, 1)


# ---------------------------------------------------------------------------
# deterministic parameter init (PyTorch-Linear-style uniform(-1/sqrt(fan_in)))
# ---------------------------------------------------------------------------
def init_params(key):
    def linear(key, fan_in, fan_out):
        kw, kb = jax.random.split(key)
        bound = 1.0 / jnp.sqrt(fan_in)
        w = jax.random.uniform(kw, (fan_in, fan_out), jnp.float32,
                               minval=-bound, maxval=bound)
        b = jax.random.uniform(kb, (fan_out,), jnp.float32,
                               minval=-bound, maxval=bound)
        return w, b

    k1, k2, k3 = jax.random.split(key, 3)
    w1, b1 = linear(k1, D_IN, HID)
    w2, b2 = linear(k2, HID, HID)
    w3, b3 = linear(k3, HID, 1)
    w3_row = w3[:, 0]                          # (HID,) head weight row
    b3_sc = b3[0]                              # scalar head bias
    gamma = jnp.ones((HID,), jnp.float32)      # LayerNorm weight init
    beta = jnp.zeros((HID,), jnp.float32)      # LayerNorm bias init
    return (w1, b1, gamma, beta, w2, b2, w3_row, b3_sc)


# pure-JAX reference with the same bf16 weight/activation casts
def _reference(x_nchw, params):
    (w1, b1, gamma, beta, w2, b2, w3_row, b3) = params
    x = x_nchw.reshape(x_nchw.shape[0], -1).astype(jnp.bfloat16)
    h1 = jnp.dot(x, w1.astype(jnp.bfloat16),
                 preferred_element_type=jnp.float32) + b1
    h1 = jnp.maximum(h1, 0.0)
    mean = jnp.mean(h1, axis=-1, keepdims=True)
    var = jnp.mean((h1 - mean) ** 2, axis=-1, keepdims=True)
    h1n = (h1 - mean) * jax.lax.rsqrt(var + LN_EPS) * gamma + beta
    h2 = jnp.dot(h1n.astype(jnp.bfloat16), w2.astype(jnp.bfloat16),
                 preferred_element_type=jnp.float32) + b2
    h2 = jnp.maximum(h2, 0.0)
    return jnp.sum(h2 * w3_row[None, :], axis=-1, keepdims=True) + b3


if __name__ == "__main__":
    key = jax.random.PRNGKey(0)
    kx, kp = jax.random.split(key)

    x = jax.random.normal(kx, (B, C, H, W), dtype=jnp.float32)
    params = init_params(kp)

    y = earth_systems_nn_forward(x, params)
    y = jax.block_until_ready(y)

    y_ref = _reference(x, params)
    assert y.shape == (B, 1)
    assert jnp.allclose(y, y_ref, atol=1e-3, rtol=1e-3), "mismatch vs reference"

    print("KERNEL_OK")
</pallas_src>

<mosaic_0001>
module attributes {stable_mosaic.version = 11 : i64} {
  func.func @_ffn_kernel(%arg0: i32, %arg1: memref<2x1024xf32, #tpu.memory_space<vmem>>, %arg2: memref<1024x128xbf16, #tpu.memory_space<vmem>>, %arg3: memref<128x128xbf16, #tpu.memory_space<vmem>>, %arg4: memref<8x128xf32, #tpu.memory_space<vmem>>, %arg5: memref<1x1x2xf32, #tpu.memory_space<vmem>>) attributes {dimension_semantics = [#tpu.dimension_semantics<parallel>], iteration_bounds = array<i64: 1>, scalar_prefetch = 0 : i64, scratch_operands = 0 : i64, tpu.core_type = #tpu.core_type<tc>, window_params = [{transform_indices = @transform_0, window_bounds = array<i64: 2, 1024>}, {pipeline_mode = #tpu.pipeline_mode<synchronous>, transform_indices = @transform_1, window_bounds = array<i64: 1024, 128>}, {pipeline_mode = #tpu.pipeline_mode<synchronous>, transform_indices = @transform_2, window_bounds = array<i64: 128, 128>}, {pipeline_mode = #tpu.pipeline_mode<synchronous>, transform_indices = @transform_3, window_bounds = array<i64: 8, 128>}, {transform_indices = @transform_4, window_bounds = array<i64: 1, 1, 2>}]} {
    %c0 = arith.constant 0 : index
    %c0_0 = arith.constant 0 : index
    %0 = vector.load %arg4[%c0, %c0_0] : memref<8x128xf32, #tpu.memory_space<vmem>>, vector<8x128xf32>
    %1 = vector.extract_strided_slice %0 {offsets = [0, 0], sizes = [1, 128], strides = [1, 1]} : vector<8x128xf32> to vector<1x128xf32>
    %2 = vector.extract_strided_slice %0 {offsets = [1, 0], sizes = [1, 128], strides = [1, 1]} : vector<8x128xf32> to vector<1x128xf32>
    %3 = vector.extract_strided_slice %0 {offsets = [2, 0], sizes = [1, 128], strides = [1, 1]} : vector<8x128xf32> to vector<1x128xf32>
    %4 = vector.extract_strided_slice %0 {offsets = [3, 0], sizes = [1, 128], strides = [1, 1]} : vector<8x128xf32> to vector<1x128xf32>
    %5 = vector.extract_strided_slice %0 {offsets = [4, 0], sizes = [1, 128], strides = [1, 1]} : vector<8x128xf32> to vector<1x128xf32>
    %6 = vector.extract_strided_slice %0 {offsets = [5, 0], sizes = [1, 1], strides = [1, 1]} : vector<8x128xf32> to vector<1x1xf32>
    %c0_1 = arith.constant 0 : index
    %c0_2 = arith.constant 0 : index
    %7 = vector.load %arg1[%c0_1, %c0_2] : memref<2x1024xf32, #tpu.memory_space<vmem>>, vector<2x1024xf32>
    %8 = arith.truncf %7 : vector<2x1024xf32> to vector<2x1024xbf16>
    %c0_3 = arith.constant 0 : index
    %c0_4 = arith.constant 0 : index
    %9 = vector.load %arg2[%c0_3, %c0_4] : memref<1024x128xbf16, #tpu.memory_space<vmem>>, vector<1024x128xbf16>
    %cst = arith.constant dense<0.000000e+00> : vector<2x128xf32>
    %10 = tpu.matmul %8, %9, %cst {dimension_numbers = #tpu.dot_dimension_numbers<[1], [0], [0], [1], [0, 0, 1, 1], [], []>} : vector<2x1024xbf16>, vector<1024x128xbf16>, vector<2x128xf32> -> vector<2x128xf32>
    %11 = vector.broadcast %1 : vector<1x128xf32> to vector<2x128xf32>
    %12 = arith.addf %10, %11 : vector<2x128xf32>
    %cst_5 = arith.constant 0.000000e+00 : f32
    %13 = vector.broadcast %cst_5 : f32 to vector<2x128xf32>
    %14 = arith.maximumf %12, %13 : vector<2x128xf32>
    %cst_6 = arith.constant dense<0.000000e+00> : vector<2xf32>
    %15 = vector.multi_reduction <add>, %14, %cst_6 [1] : vector<2x128xf32> to vector<2xf32>
    %16 = vector.shape_cast %15 : vector<2xf32> to vector<2x1xf32>
    %cst_7 = arith.constant 1.280000e+02 : f32
    %17 = vector.broadcast %cst_7 : f32 to vector<2x1xf32>
    %18 = arith.divf %16, %17 : vector<2x1xf32>
    %19 = vector.broadcast %18 : vector<2x1xf32> to vector<2x128xf32>
    %20 = arith.subf %14, %19 : vector<2x128xf32>
    %21 = arith.mulf %20, %20 : vector<2x128xf32>
    %cst_8 = arith.constant dense<0.000000e+00> : vector<2xf32>
    %22 = vector.multi_reduction <add>, %21, %cst_8 [1] : vector<2x128xf32> to vector<2xf32>
    %23 = vector.shape_cast %22 : vector<2xf32> to vector<2x1xf32>
    %cst_9 = arith.constant 1.280000e+02 : f32
    %24 = vector.broadcast %cst_9 : f32 to vector<2x1xf32>
    %25 = arith.divf %23, %24 : vector<2x1xf32>
    %cst_10 = arith.constant 9.99999974E-6 : f32
    %26 = vector.broadcast %cst_10 : f32 to vector<2x1xf32>
    %27 = arith.addf %25, %26 : vector<2x1xf32>
    %28 = math.rsqrt %27 : vector<2x1xf32>
    %29 = vector.broadcast %28 : vector<2x1xf32> to vector<2x128xf32>
    %30 = arith.mulf %20, %29 : vector<2x128xf32>
    %31 = vector.broadcast %2 : vector<1x128xf32> to vector<2x128xf32>
    %32 = arith.mulf %30, %31 : vector<2x128xf32>
    %33 = vector.broadcast %3 : vector<1x128xf32> to vector<2x128xf32>
    %34 = arith.addf %32, %33 : vector<2x128xf32>
    %35 = arith.truncf %34 : vector<2x128xf32> to vector<2x128xbf16>
    %c0_11 = arith.constant 0 : index
    %c0_12 = arith.constant 0 : index
    %36 = vector.load %arg3[%c0_11, %c0_12] : memref<128x128xbf16, #tpu.memory_space<vmem>>, vector<128x128xbf16>
    %cst_13 = arith.constant dense<0.000000e+00> : vector<2x128xf32>
    %37 = tpu.matmul %35, %36, %cst_13 {dimension_numbers = #tpu.dot_dimension_numbers<[1], [0], [0], [1], [0, 0, 1, 1], [], []>} : vector<2x128xbf16>, vector<128x128xbf16>, vector<2x128xf32> -> vector<2x128xf32>
    %38 = vector.broadcast %4 : vector<1x128xf32> to vector<2x128xf32>
    %39 = arith.addf %37, %38 : vector<2x128xf32>
    %cst_14 = arith.constant 0.000000e+00 : f32
    %40 = vector.broadcast %cst_14 : f32 to vector<2x128xf32>
    %41 = arith.maximumf %39, %40 : vector<2x128xf32>
    %cst_15 = arith.constant dense<0.000000e+00> : vector<1x2xf32>
    %42 = tpu.matmul %5, %41, %cst_15 {dimension_numbers = #tpu.dot_dimension_numbers<[1], [1], [0], [0], [0, 0, 1, 0], [], []>} : vector<1x128xf32>, vector<2x128xf32>, vector<1x2xf32> -> vector<1x2xf32>
    %43 = vector.broadcast %6 : vector<1x1xf32> to vector<1x2xf32>
    %44 = arith.addf %42, %43 : vector<1x2xf32>
    %45 = vector.shape_cast %44 : vector<1x2xf32> to vector<1x1x2xf32>
    %c0_16 = arith.constant 0 : index
    %c0_17 = arith.constant 0 : index
    %c0_18 = arith.constant 0 : index
    %46 = vector.load %arg5[%c0_16, %c0_17, %c0_18] : memref<1x1x2xf32, #tpu.memory_space<vmem>>, vector<1x1x2xf32>
    tpu.vector_store %arg5[%c0_16, %c0_17, %c0_18], %45 {strides = array<i32>} : memref<1x1x2xf32, #tpu.memory_space<vmem>>, vector<1x1x2xf32>,
    return
  }
  func.func @transform_0(%arg0: i32) -> (i32, i32) {
    %c0_i32 = arith.constant 0 : i32
    %c0_i32_0 = arith.constant 0 : i32
    return %arg0, %c0_i32 : i32, i32
  }
  func.func @transform_1(%arg0: i32) -> (i32, i32) {
    %c0_i32 = arith.constant 0 : i32
    %c0_i32_0 = arith.constant 0 : i32
    %c0_i32_1 = arith.constant 0 : i32
    return %c0_i32, %c0_i32_0 : i32, i32
  }
  func.func @transform_2(%arg0: i32) -> (i32, i32) {
    %c0_i32 = arith.constant 0 : i32
    %c0_i32_0 = arith.constant 0 : i32
    %c0_i32_1 = arith.constant 0 : i32
    return %c0_i32, %c0_i32_0 : i32, i32
  }
  func.func @transform_3(%arg0: i32) -> (i32, i32) {
    %c0_i32 = arith.constant 0 : i32
    %c0_i32_0 = arith.constant 0 : i32
    %c0_i32_1 = arith.constant 0 : i32
    return %c0_i32, %c0_i32_0 : i32, i32
  }
  func.func @transform_4(%arg0: i32) -> (i32, i32, i32) {
    %c0_i32 = arith.constant 0 : i32
    %c0_i32_0 = arith.constant 0 : i32
    %c0_i32_1 = arith.constant 0 : i32
    return %arg0, %c0_i32, %c0_i32_0 : i32, i32, i32
  }
}

</mosaic_0001>

<bundles_post_ra>
// kernel: tpu_custom_call.1
= control target key start
LH: loop header
LB: loop body
LE: loop exit
PB: predicated region body
PF: predicated region fallthrough
CT: control target
= control target key end

     0   :  { %9 = vsyncpa [#allocation3], 0  ;;  %s1501_s0 = inlined_call_operand.hbm [shape: f32[2,1024], index: 0, kind: input, shape index: {}]   ;;  %s1502_s1 = inlined_call_operand.hbm [shape: bf16[1024,128], index: 1, kind: input, shape index: {}]   ;;  %s1503_s2 = inlined_call_operand.hbm [shape: bf16[128,128], index: 2, kind: input, shape index: {}]   ;;  %s1504_s3 = inlined_call_operand.hbm [shape: f32[8,128], index: 3, kind: input, shape index: {}]   ;;  %s1505_s4 = inlined_call_operand.hbm [shape: f32[1,1,2], index: 4, kind: output, shape index: {}]  }
   0x1   :  { %10 = vsyncpa [#allocation6], 0 }
   0x2   :  { %11 = vsyncpa [#allocation9], 0 }
   0x3   :  { %12 = vsyncpa [#allocation4], 0  ;;  %s1427_s15 = smov [#allocation5]  }
   0x4   :  { %s28_s16 = sshll.u32 %s1427_s15, 4  ;;  %s29_s16 = int_to_ptr.vmem [resolvable:$true] %s28_s16 }
   0x5   :  { %s1327_s17 = scalar_lea.vmem %s29_s16, 8192  ;;  %p1332_p1 = scmp.lt.s32.totalorder %s29_s16, %s29_s16 }
   0x6   :  { %p1328_p0 = scmp.ne.s32.totalorder %s29_s16, %s1327_s17  ;;  %p1333_p2 = scmp.lt.s32.totalorder %s1327_s17, %s1327_s17 }
   0x8   :  { %p1334_p3 = por %p1333_p2, %p1332_p1 }
   0xa   :  { %p1335_p4 = pnand %p1334_p3, %p1328_p0 }
   0xc   :  { %1338 = shalt.err (!%p1335_p4)
}
   0xd   :  { %s1428_s18 = smov 64   ;;  %s1429_s19 = smov 4  }
   0xe   :  { %34 = dma.hbm_to_vmem [thread:$0]  %s1502_s1, 8192, %s29_s16, [#allocation6], %s1428_s18, %s1428_s18, %s1429_s19  }
   0xf   :  { %s1430_s22 = smov [#allocation2]   ;;  %s1431_s24 = smov [#allocation7]  }
  0x10   :  { %s19_s23 = sshll.u32 %s1430_s22, 4  ;;  %s40_s25 = sshll.u32 %s1431_s24, 4  ;;  %s20_s23 = int_to_ptr.vmem [resolvable:$true] %s19_s23  ;;  %s41_s25 = int_to_ptr.vmem [resolvable:$true] %s40_s25 }
  0x11   :  { %s1347_s26 = scalar_lea.vmem %s20_s23, 256  ;;  %p1352_p6 = scmp.lt.s32.totalorder %s20_s23, %s20_s23 }
  0x12   :  { %p1348_p5 = scmp.ne.s32.totalorder %s20_s23, %s1347_s26  ;;  %p1353_p7 = scmp.lt.s32.totalorder %s1347_s26, %s1347_s26 }
  0x14   :  { %p1354_p8 = por %p1353_p7, %p1352_p6 }
  0x16   :  { %p1355_p9 = pnand %p1354_p8, %p1348_p5 }
  0x18   :  { %1358 = shalt.err (!%p1355_p9)
}
  0x19   :  { %22 = dma.hbm_to_vmem [thread:$0]  %s1501_s0, 256, %s20_s23, [#allocation3]  }
  0x1a   :  { %s1367_s29 = scalar_lea.vmem %s41_s25, 1024  ;;  %p1372_p11 = scmp.lt.s32.totalorder %s41_s25, %s41_s25 }
  0x1b   :  { %p1368_p10 = scmp.ne.s32.totalorder %s41_s25, %s1367_s29  ;;  %p1373_p12 = scmp.lt.s32.totalorder %s1367_s29, %s1367_s29 }
  0x1d   :  { %p1374_p13 = por %p1373_p12, %p1372_p11 }
  0x1f   :  { %p1375_p0 = pnand %p1374_p13, %p1368_p10 }
  0x21   :  { %1378 = shalt.err (!%p1375_p0)
}
  0x22   :  { %46 = dma.hbm_to_vmem [thread:$0]  %s1503_s2, 1024, %s41_s25, [#allocation6], %s1428_s18, %s1428_s18, %s1429_s19  }
  0x23   :  { %s1432_s5 = smov [#allocation8]  }
  0x24   :  { %s53_s6 = sshll.u32 %s1432_s5, 4  ;;  %s54_s6 = int_to_ptr.vmem [resolvable:$true] %s53_s6 }
  0x25   :  { %s1387_s7 = scalar_lea.vmem %s54_s6, 128  ;;  %p1392_p2 = scmp.lt.s32.totalorder %s54_s6, %s54_s6 }
  0x26   :  { %p1388_p1 = scmp.ne.s32.totalorder %s54_s6, %s1387_s7  ;;  %p1393_p3 = scmp.lt.s32.totalorder %s1387_s7, %s1387_s7 }
  0x28   :  { %p1394_p4 = por %p1393_p3, %p1392_p2 }
  0x2a   :  { %p1395_p5 = pnand %p1394_p4, %p1388_p1 }
  0x2c   :  { %1398 = shalt.err (!%p1395_p5)
}
  0x2d   :  { %56 = dma.hbm_to_vmem [thread:$0]  %s1504_s3, 128, %s54_s6, [#allocation9]  }
  0x2e   :  { %1419 = dma.done.wait [#allocation3], 256  }
  0x2f   :  { %1420 = vsyncadd [#allocation3], 4294967040 }
  0x30   :  { %1421 = dma.done.wait [#allocation6], 9216  }
  0x31   :  { %1422 = vsyncadd [#allocation6], 4294958080 }
  0x32   :  { %1423 = dma.done.wait [#allocation9], 128  }
  0x33   :  { %1424 = vsyncadd [#allocation9], 4294967168  ;;  %v1243_v0 = vld [vmem:[#allocation5 + $0x78] sm:$0xff]   ;;  %v1247_v4 = vld [vmem:[#allocation5 + $0x70] sm:$0xff]   ;;  %v1433_v22 = vmov 1983009808   ;;  %v79_v24 = vlaneseq }
  0x34   :  { %v1244_v1 = vld [vmem:[#allocation5 + $0xf8] sm:$0xff]   ;;  %1106 = vmatprep.subr.bf16.mxu0 %v1243_v0  ;;  %v1248_v5 = vld [vmem:[#allocation5 + $0xf0] sm:$0xff]   ;;  %v1251_v8 = vld [vmem:[#allocation5 + $0x68] sm:$0xff]   ;;  %v77_v23 = vunpack.c.l.s4 %v1433_v22  ;;  %vm802_vm0 = vcmask 1041408   ;;  %vm1435_vm1 = vmmov 0   ;;  %s1437_s2 = smov [#allocation10]  }
  0x35   :  { %v1245_v2 = vld [vmem:[#allocation5 + $0x38] sm:$0xff]   ;;  %1128 = vmatprep.subr.bf16.mxu1 %v1244_v1  ;;  %v1249_v6 = vld [vmem:[#allocation5 + $0x30] sm:$0xff]   ;;  %v1252_v9 = vld [vmem:[#allocation5 + $0xe8] sm:$0xff]   ;;  %v1475_v30 = vshrl.u32 %v79_v24, 7  ;;  %s1023_s3 = sshll.u32 %s1437_s2, 4  ;;  %vm1015_vm2 = vcmask 8192   ;;  %s1024_s3 = int_to_ptr.vmem [resolvable:$true] %s1023_s3 }
  0x36   :  { %v1246_v3 = vld [vmem:[#allocation5 + $0xb8] sm:$0xff]   ;;  %1107 = vmatpush3.bf16.msra.mxu0 %v1245_v2  ;;  %v1250_v7 = vld [vmem:[#allocation5 + $0xb0] sm:$0xff]   ;;  %v1253_v10 = vld [vmem:[#allocation5 + $0x28] sm:$0xff]   ;;  %v78_v29 = vunpack.c.0.s8 %v77_v23  ;;  %s1399_s9 = scalar_lea.vmem %s1024_s3, 16  ;;  %s1403_s10 = scalar_lea.vmem %s1024_s3, 32 }
  0x37   :  { %1129 = vmatpush3.bf16.msra.mxu1 %v1246_v3  ;;  %1108 = vmatprep.subr.bf16.mxu0 %v1247_v4  ;;  %v1254_v11 = vld [vmem:[#allocation5 + $0xa8] sm:$0xff]   ;;  %v1255_v12 = vld [vmem:[#allocation5 + $0x60] sm:$0xff]   ;;  %v1259_v16 = vld [vmem:[#allocation5 + $0x58] sm:$0xff]   ;;  %p1400_p6 = scmp.ne.s32.totalorder %s1024_s3, %s1399_s9  ;;  %p1404_p7 = scmp.lt.s32.totalorder %s1024_s3, %s1024_s3 }
  0x38   :  { %1130 = vmatprep.subr.bf16.mxu1 %v1248_v5  ;;  %v1256_v13 = vld [vmem:[#allocation5 + $0xe0] sm:$0xff]   ;;  %v1260_v17 = vld [vmem:[#allocation5 + $0xd8] sm:$0xff]   ;;  %v1263_v20 = vld [vmem:[#allocation5 + $0x50] sm:$0xff]   ;;  %v1478_v35 = vsub.s32 %v78_v29, %v1475_v30  ;;  %p1405_p8 = scmp.lt.s32.totalorder %s1403_s10, %s1399_s9 }
  0x39   :  { %v1257_v14 = vld [vmem:[#allocation5 + $0x20] sm:$0xff]   ;;  %v1261_v18 = vld [vmem:[#allocation5 + $0x18] sm:$0xff]   ;;  %v1264_v21 = vld [vmem:[#allocation5 + $0xd0] sm:$0xff]  }
  0x3a   :  { %1109 = vmatpush3.bf16.msra.mxu0 %v1249_v6  ;;  %v1258_v15 = vld [vmem:[#allocation5 + $0xa0] sm:$0xff]   ;;  %v1262_v19 = vld [vmem:[#allocation5 + $0x98] sm:$0xff]   ;;  %v1265_v25 = vld [vmem:[#allocation5 + $0x10] sm:$0xff]   ;;  %p1406_p9 = por %p1405_p8, %p1404_p7 }
  0x3b   :  { %1131 = vmatpush3.bf16.msra.mxu1 %v1250_v7  ;;  %1110 = vmatprep.subr.bf16.mxu0 %v1251_v8  ;;  %v1266_v26 = vld [vmem:[#allocation5 + $0x90] sm:$0xff]   ;;  %v1267_v27 = vld [vmem:[#allocation5 + $0x48] sm:$0xff]   ;;  %v1271_v33 = vld [vmem:[#allocation5 + $0x40] sm:$0xff]  }
  0x3c   :  { %1132 = vmatprep.subr.bf16.mxu1 %v1252_v9  ;;  %v1268_v28 = vld [vmem:[#allocation5 + $0xc8] sm:$0xff]   ;;  %v1272_v34 = vld [vmem:[#allocation5 + $0xc0] sm:$0xff]   ;;  %v71_v38 = vld [vmem:[#allocation2] sm:$0xff]  ;;  %p1407_p10 = pnand %p1406_p9, %p1400_p6 }
  0x3d   :  { %v1269_v31 = vld [vmem:[#allocation5 + $0x8] sm:$0xff]   ;;  %v1273_v36 = vld [vmem:[#allocation5] sm:$0xff]   ;;  %v82_v39 = vrot.slane %v71_v38, %v1478_v35  ;;  %v75_v40 = vcombine.high %v71_v38, %v71_v38  ;;  %v1276_v41 = vld [vmem:[#allocation5 + $0x178] sm:$0xff]  }
  0x3e   :  { %1111 = vmatpush3.bf16.msra.mxu0 %v1253_v10  ;;  %v1270_v32 = vld [vmem:[#allocation5 + $0x88] sm:$0xff]   ;;  %v1274_v37 = vld [vmem:[#allocation5 + $0x80] sm:$0xff]   ;;  %v1277_v42 = vld [vmem:[#allocation5 + $0x1f8] sm:$0xff]  }
  0x3f   :  { %1133 = vmatpush3.bf16.msra.mxu1 %v1254_v11  ;;  %1112 = vmatprep.subr.bf16.mxu0 %v1255_v12  ;;  %v90_v43 = vcombine.high %v82_v39, %v82_v39  ;;  %v89_v44 = vrot.slane %v75_v40, %v1478_v35  ;;  %v117_v45 = vpack.c.bf16 %v82_v39, %v82_v39  ;;  %v1278_v46 = vld [vmem:[#allocation5 + $0x138] sm:$0xff]   ;;  %v1280_v51 = vld [vmem:[#allocation5 + $0x170] sm:$0xff]   ;;  %v1284_v56 = vld [vmem:[#allocation5 + $0x168] sm:$0xff]  }
  0x40   :  { %1134 = vmatprep.subr.bf16.mxu1 %v1256_v13  ;;  %v1279_v49 = vld [vmem:[#allocation5 + $0x1b8] sm:$0xff]   ;;  %v1281_v53 = vld [vmem:[#allocation5 + $0x1f0] sm:$0xff]   ;;  %v1285_v57 = vld [vmem:[#allocation5 + $0x1e8] sm:$0xff]  }
  0x41   :  { %v118_v47 = vpack.c.bf16 %v90_v43, %v90_v43  ;;  %v91_v48 = vcombine.high %v89_v44, %v89_v44  ;;  %v119_v50 = vpack.c.bf16 %v89_v44, %v89_v44  ;;  %v1282_v54 = vld [vmem:[#allocation5 + $0x130] sm:$0xff]   ;;  %v1286_v58 = vld [vmem:[#allocation5 + $0x128] sm:$0xff]   ;;  %v1288_v60 = vld [vmem:[#allocation5 + $0x160] sm:$0xff]  }
  0x42   :  { %1113 = vmatpush3.bf16.msra.mxu0 %v1257_v14  ;;  %v1283_v55 = vld [vmem:[#allocation5 + $0x1b0] sm:$0xff]   ;;  %v1287_v59 = vld [vmem:[#allocation5 + $0x1a8] sm:$0xff]   ;;  %v1289_v61 = vld [vmem:[#allocation5 + $0x1e0] sm:$0xff]  }
  0x43   :  { %1135 = vmatpush3.bf16.msra.mxu1 %v1258_v15  ;;  %1114 = vmatprep.subr.bf16.mxu0 %v1259_v16  ;;  %v120_v52 = vpack.c.bf16 %v91_v48, %v91_v48  ;;  %v1290_v62 = vld [vmem:[#allocation5 + $0x120] sm:$0xff]   ;;  %v1292_v0 = vld [vmem:[#allocation5 + $0x158] sm:$0xff]   ;;  %v1296_v4 = vld [vmem:[#allocation5 + $0x150] sm:$0xff]  }
  0x44   :  { %1136 = vmatprep.subr.bf16.mxu1 %v1260_v17  ;;  %673 = vmatprep.mubr.bf16.mxu0 %v118_v47  ;;  %v1291_v63 = vld [vmem:[#allocation5 + $0x1a0] sm:$0xff]   ;;  %v1293_v1 = vld [vmem:[#allocation5 + $0x1d8] sm:$0xff]   ;;  %v1297_v5 = vld [vmem:[#allocation5 + $0x1d0] sm:$0xff]  }
  0x45   :  { %713 = vmatprep.mubr.bf16.mxu1 %v120_v52  ;;  %v1294_v2 = vld [vmem:[#allocation5 + $0x118] sm:$0xff]   ;;  %v1298_v6 = vld [vmem:[#allocation5 + $0x110] sm:$0xff]   ;;  %v1300_v8 = vld [vmem:[#allocation5 + $0x148] sm:$0xff]  }
  0x46   :  { %1115 = vmatpush3.bf16.msra.mxu0 %v1261_v18  ;;  %v1295_v3 = vld [vmem:[#allocation5 + $0x198] sm:$0xff]   ;;  %v1299_v7 = vld [vmem:[#allocation5 + $0x190] sm:$0xff]   ;;  %v1301_v9 = vld [vmem:[#allocation5 + $0x1c8] sm:$0xff]  }
  0x47   :  { %1137 = vmatpush3.bf16.msra.mxu1 %v1262_v19  ;;  %1116 = vmatprep.subr.bf16.mxu0 %v1263_v20  ;;  %v1302_v10 = vld [vmem:[#allocation5 + $0x108] sm:$0xff]   ;;  %v1304_v12 = vld [vmem:[#allocation5 + $0x140] sm:$0xff]   ;;  %v72_v15 = vld [vmem:[#allocation2 + $0x8] sm:$0xff] }
  0x48   :  { %1138 = vmatprep.subr.bf16.mxu1 %v1264_v21  ;;  %v1303_v11 = vld [vmem:[#allocation5 + $0x188] sm:$0xff]   ;;  %v1305_v13 = vld [vmem:[#allocation5 + $0x1c0] sm:$0xff]   ;;  %v99_v17 = vrot.slane %v72_v15, %v1478_v35  ;;  %v92_v18 = vcombine.high %v72_v15, %v72_v15 }
  0x49   :  { %v1306_v14 = vld [vmem:[#allocation5 + $0x100] sm:$0xff]  }
  0x4a   :  { %1117 = vmatpush3.bf16.msra.mxu0 %v1265_v25  ;;  %v1307_v16 = vld [vmem:[#allocation5 + $0x180] sm:$0xff]   ;;  %v107_v19 = vcombine.high %v99_v17, %v99_v17  ;;  %v106_v20 = vrot.slane %v92_v18, %v1478_v35  ;;  %v121_v21 = vpack.c.bf16 %v99_v17, %v99_v17  ;;  %v255_v35 = vsub.s32 0, %v1475_v30 }
  0x4b   :  { %1139 = vmatpush3.bf16.msra.mxu1 %v1266_v26  ;;  %1118 = vmatprep.subr.bf16.mxu0 %v1267_v27  ;;  %v1436_v18 = vmov 0  }
  0x4c   :  { %1140 = vmatprep.subr.bf16.mxu1 %v1268_v28  ;;  %v122_v22 = vpack.c.bf16 %v107_v19, %v107_v19  ;;  %v108_v23 = vcombine.high %v106_v20, %v106_v20  ;;  %v123_v24 = vpack.c.bf16 %v106_v20, %v106_v20  ;;  %1241 = vset.pattern.permute.xlu1 %v1436_v18  ;;  %v846_v19 = vsub.s32 3, %v1475_v30 }
  0x4d   :  { %1242 = vset.pattern.permute.xlu0 %v1436_v18 }
  0x4e   :  { %1119 = vmatpush3.bf16.msra.mxu0 %v1269_v31  ;;  %v124_v25 = vpack.c.bf16 %v108_v23, %v108_v23 }
  0x4f   :  { %1141 = vmatpush3.bf16.msra.mxu1 %v1270_v32  ;;  %1120 = vmatprep.subr.bf16.mxu0 %v1271_v33 }
  0x50   :  { %1142 = vmatprep.subr.bf16.mxu1 %v1272_v34 }
  0x52   :  { %1121 = vmatpush3.bf16.msra.mxu0 %v1273_v36  ;;  %v1485_v36 = vld [vmem:[#allocation8] sm:$0xff] }
  0x53   :  { %1143 = vmatpush3.bf16.msra.mxu1 %v1274_v37  ;;  %1150 = vmatprep.subr.bf16.mxu0 %v1276_v41  ;;  %v256_v37 = vrot.slane %v1485_v36, %v255_v35  ;;  %v847_v20 = vrot.slane %v1485_v36, %v846_v19 }
  0x54   :  { %1172 = vmatprep.subr.bf16.mxu1 %v1277_v42  ;;  %939 = vperm.xlu1 %1241, %v1485_v36  }
  0x55   :  { %674 = vmatmul.mubr.bf16.vlgmr.msra.gmra.mxu0 %v117_v45 }
  0x56   :  { %1151 = vmatpush3.bf16.msra.mxu0 %v1278_v46  ;;  %714 = vmatmul.mubr.bf16.vlgmr.msra.gmra.mxu1 %v119_v50 }
  0x57   :  { %1152 = vmatprep.subr.bf16.mxu0 %v1280_v51  ;;  %1173 = vmatpush3.bf16.msra.mxu1 %v1279_v49 }
  0x58   :  { %1174 = vmatprep.subr.bf16.mxu1 %v1281_v53  ;;  %753 = vmatprep.mubr.bf16.mxu0 %v122_v22 }
  0x59   :  { %793 = vmatprep.mubr.bf16.mxu1 %v124_v25 }
  0x5a   :  { %1153 = vmatpush3.bf16.msra.mxu0 %v1282_v54 }
  0x5b   :  { %1154 = vmatprep.subr.bf16.mxu0 %v1284_v56  ;;  %1175 = vmatpush3.bf16.msra.mxu1 %v1283_v55  ;;  %v1309_v56 = vld [vmem:[#allocation7 + $0x38] sm:$0xff]  }
  0x5c   :  { %1176 = vmatprep.subr.bf16.mxu1 %v1285_v57  ;;  %v1434_v57 = vmov 0.0  }
  0x5e   :  { %1155 = vmatpush3.bf16.msra.mxu0 %v1286_v58  ;;  %v1310_v58 = vld [vmem:[#allocation7 + $0x30] sm:$0xff]  }
  0x5f   :  { %1156 = vmatprep.subr.bf16.mxu0 %v1288_v60  ;;  %1177 = vmatpush3.bf16.msra.mxu1 %v1287_v59 }
  0x60   :  { %1178 = vmatprep.subr.bf16.mxu1 %v1289_v61 }
  0x62   :  { %1157 = vmatpush3.bf16.msra.mxu0 %v1290_v62 }
  0x63   :  { %1158 = vmatprep.subr.bf16.mxu0 %v1292_v0  ;;  %1179 = vmatpush3.bf16.msra.mxu1 %v1291_v63  ;;  %v1311_v0 = vld [vmem:[#allocation7 + $0x28] sm:$0xff]  }
  0x64   :  { %1180 = vmatprep.subr.bf16.mxu1 %v1293_v1  ;;  %v1312_v1 = vld [vmem:[#allocation7 + $0x20] sm:$0xff]  }
  0x66   :  { %1159 = vmatpush3.bf16.msra.mxu0 %v1294_v2  ;;  %v1313_v2 = vld [vmem:[#allocation7 + $0x18] sm:$0xff]  }
  0x67   :  { %1160 = vmatprep.subr.bf16.mxu0 %v1296_v4  ;;  %1181 = vmatpush3.bf16.msra.mxu1 %v1295_v3  ;;  %v1314_v3 = vld [vmem:[#allocation7 + $0x10] sm:$0xff]   ;;  %v1315_v4 = vld [vmem:[#allocation7 + $0x8] sm:$0xff]  }
  0x68   :  { %1182 = vmatprep.subr.bf16.mxu1 %v1297_v5  ;;  %v1316_v5 = vld [vmem:[#allocation7] sm:$0xff]  }
  0x6a   :  { %1161 = vmatpush3.bf16.msra.mxu0 %v1298_v6 }
  0x6b   :  { %1162 = vmatprep.subr.bf16.mxu0 %v1300_v8  ;;  %1183 = vmatpush3.bf16.msra.mxu1 %v1299_v7 }
  0x6c   :  { %1184 = vmatprep.subr.bf16.mxu1 %v1301_v9  ;;  %v819_v9 = vsub.s32 1, %v1475_v30 }
  0x6e   :  { %1163 = vmatpush3.bf16.msra.mxu0 %v1302_v10  ;;  %v824_v10 = vsub.s32 2, %v1475_v30 }
  0x6f   :  { %1164 = vmatprep.subr.bf16.mxu0 %v1304_v12  ;;  %1185 = vmatpush3.bf16.msra.mxu1 %v1303_v11  ;;  %v820_v11 = vrot.slane %v1485_v36, %v819_v9 }
  0x70   :  { %1186 = vmatprep.subr.bf16.mxu1 %v1305_v13 }
  0x72   :  { %1165 = vmatpush3.bf16.msra.mxu0 %v1306_v14  ;;  %v825_v14 = vrot.slane %v1485_v36, %v824_v10 }
  0x73   :  { %1187 = vmatpush3.bf16.msra.mxu1 %v1307_v16  ;;  %1205 = vmatprep.subr.bf16.mxu0 %v1434_v57 }
  0x74   :  { %1225 = vmatprep.subr.mxu1 %v1434_v57 }
  0x75   :  { %754 = vmatmul.mubr.bf16.vlgmr.msra.gmra.mxu0 %v121_v21 }
  0x76   :  { %794 = vmatmul.mubr.bf16.vlgmr.msra.gmra.mxu1 %v123_v24  ;;  %1206 = vmatpush3.bf16.msra.mxu0 %v1309_v56 }
  0x77   :  { %1207 = vmatprep.subr.bf16.mxu0 %v1434_v57  ;;  %1221 = vmatprep.mubr.msk.bf16.mxu0 %vm1435_vm1, %v1434_v57 }
  0x78   :  { %1227 = vmatprep.mubr.msk.f32.mxu1 %vm1435_vm1, %v1434_v57 }
  0x7a   :  { %1208 = vmatpush3.bf16.msra.mxu0 %v1310_v58 }
  0x7b   :  { %1209 = vmatprep.subr.bf16.mxu0 %v1434_v57 }
  0x7e   :  { %1210 = vmatpush3.bf16.msra.mxu0 %v1311_v0 }
  0x7f   :  { %1211 = vmatprep.subr.bf16.mxu0 %v1434_v57 }
  0x82   :  { %1212 = vmatpush3.bf16.msra.mxu0 %v1312_v1 }
  0x83   :  { %1213 = vmatprep.subr.bf16.mxu0 %v1434_v57 }
  0x86   :  { %1214 = vmatpush3.bf16.msra.mxu0 %v1313_v2 }
  0x87   :  { %1215 = vmatprep.subr.bf16.mxu0 %v1434_v57 }
  0x8a   :  { %1216 = vmatpush3.bf16.msra.mxu0 %v1314_v3 }
  0x8b   :  { %1217 = vmatprep.subr.bf16.mxu0 %v1434_v57 }
  0x8e   :  { %1218 = vmatpush3.bf16.msra.mxu0 %v1315_v4 }
  0x8f   :  { %1219 = vmatprep.subr.bf16.mxu0 %v1434_v57 }
  0x92   :  { %1220 = vmatpush3.bf16.msra.mxu0 %v1316_v5 }
 0x115   :  { %v1122_v26 = vpop.f32.mrf.mxu0 }
 0x116   :  { %v1144_v27 = vpop.f32.mrf.mxu1 }
 0x117   :  { %v1123_v28 = vpop.f32.mrf.mxu0 }
 0x118   :  { %v1145_v29 = vpop.f32.mrf.mxu1  ;;  %v1124_v38 = vadd.f32 %v1123_v28, %v1122_v26  ;;  %v941_v26 = vrot.slane %v1485_v36, 4  ;;  %v940_v28 = vpop.permute.xlu1 %939 }
 0x119   :  { %v1125_v31 = vpop.f32.mrf.mxu0  ;;  %v1146_v40 = vadd.f32 %v1145_v29, %v1144_v27  ;;  %v943_v29 = vrot.slane %v940_v28, 5 }
 0x11a   :  { %v1147_v32 = vpop.f32.mrf.mxu1  ;;  %v676_v39 = vadd.f32 %v1124_v38, %v256_v37 }
 0x11b   :  { %v1126_v33 = vpop.f32.mrf.mxu0 }
 0x11c   :  { %v1148_v34 = vpop.f32.mrf.mxu1  ;;  %v716_v44 = vadd.f32 %v1146_v40, %v676_v39 }
 0x135   :  { %v1166_v41 = vpop.f32.mrf.mxu0 }
 0x136   :  { %v1188_v42 = vpop.f32.mrf.mxu1 }
 0x137   :  { %v1167_v43 = vpop.f32.mrf.mxu0 }
 0x138   :  { %v1168_v45 = vadd.f32 %v1167_v43, %v1166_v41  ;;  %v1189_v46 = vpop.f32.mrf.mxu1 }
 0x139   :  { %v1169_v47 = vpop.f32.mrf.mxu0  ;;  %v1190_v49 = vadd.f32 %v1189_v46, %v1188_v42 }
 0x13a   :  { %v756_v48 = vadd.f32 %v1168_v45, %v716_v44  ;;  %v1191_v50 = vpop.f32.mrf.mxu1 }
 0x13b   :  { %v1170_v51 = vpop.f32.mrf.mxu0 }
 0x13c   :  { %v796_v52 = vadd.f32 %v1190_v49, %v756_v48  ;;  %v1192_v53 = vpop.f32.mrf.mxu1 }
 0x13e   :  { %v801_v54 = vmax.f32 %v796_v52, 0.0 }
 0x140   :  { %v803_v55 = vsel %vm802_vm0, %v801_v54, 0.0 }
 0x141   :  { %804 = vadd.xlane.f32.xlu0 %v803_v55 }
 0x1ca   :  { %v805_v59 = vpop.xlane.xlu0 %804 }
 0x1cb   :  { %v807_v60 = vmul.f32 0.0078125, %v805_v59 }
 0x1cd   :  { %v808_v61 = vsub.f32 %v801_v54, %v807_v60 }
 0x1cf   :  { %v809_v62 = vmul.f32 %v808_v61, %v808_v61 }
 0x1d1   :  { %v810_v63 = vsel %vm802_vm0, %v809_v62, 0.0 }
 0x1d2   :  { %811 = vadd.xlane.f32.xlu0 %v810_v63 }
 0x25b   :  { %v812_v6 = vpop.xlane.xlu0 %811 }
 0x25c   :  { %v813_v7 = vmul.f32 0.0078125, %v812_v6 }
 0x25e   :  { %v814_v8 = vadd.f32 1e-05, %v813_v7 }
 0x260   :  { %1317 = vrsqrt.f32 %v814_v8 }
 0x26d   :  { %v1318_v12 = vpop.eup %1317 }
 0x26e   :  { %v816_v13 = vmul.f32 %v1318_v12, %v808_v61 }
 0x270   :  { %v821_v15 = vmul.f32 %v820_v11, %v816_v13 }
 0x272   :  { %v826_v16 = vadd.f32 %v825_v14, %v821_v15 }
 0x274   :  { %v827_v17 = vpack.c.bf16 %v826_v16, %v826_v16 }
 0x276   :  { %1222 = vmatmul.mubr.bf16.vlgmr.msra.gmra.mxu0 %v827_v17 }
 0x336   :  { %v930_v21 = vpop.f32.mrf.mxu0 }
 0x337   :  { %v931_v22 = vadd.f32 %v930_v21, %v847_v20 }
 0x338   :  { %v1223_v23 = vpop.f32.mrf.mxu0 }
 0x339   :  { %v936_v24 = vmax.f32 %v931_v22, 0.0 }
 0x33a   :  { %v933_v25 = vpop.f32.mrf.mxu0 }
 0x33b   :  { %1226 = vmatpush3.xpose.msra.mxu1 %v936_v24 }
 0x33c   :  { %v1224_v27 = vpop.f32.mrf.mxu0 }
 0x33e   :  { %1228 = vmatmul.mubr.f32.vlgmr.msra.gmra.mxu1 %v941_v26 }
 0x3fe   :  { %v1011_v31 = vpop.f32.mrf.mxu1 }
 0x3ff   :  { %v1012_v32 = vadd.f32 %v1011_v31, %v943_v29 }
 0x400   :  { %v1229_v30 = vpop.f32.mrf.mxu1 }
 0x401   :  { %1016 = vst.msk [vmem:[#allocation10] sm:$0x1] %vm1015_vm2, %v1012_v32 }
 0x402   :  { %1410 = shalt.err (!%p1407_p10)
}
 0x403   :  { %1026 = dma.vmem_to_hbm [thread:$0]  %s1024_s3, 16, %s1505_s4, [#allocation4]  }
 0x404   :  { %1425 = dma.done.wait [#allocation4], 16  }
 0x405   :  { %1426 = vsyncadd [#allocation4], 4294967280 }
 0x406   :  { %1030 = vsyncpa [#allocation3], 1 }
 0x407   :  { %1031 = vsyncpa [#allocation6], 1 }
 0x408   :  { %1032 = vsyncpa [#allocation9], 1 }
 0x409   :  { %1033 = vsyncpa [#allocation4], 1 }

</bundles_post_ra>
